<compile_context>
chip_gen: v7x
topology: tpu7x:2x2x1
jax: 0.10.0
libtpu: 0.0.40
codegen_flags: <defaults>
</compile_context>

<pallas_src>
import functools
import math

import jax
import jax.numpy as jnp
from jax.experimental import pallas as pl
from jax.experimental.pallas import tpu as pltpu


def _layer_scale_kernel(x_ref, gamma_ref, o_ref):
    # One vld + vmul + vst per vreg.  gamma's block index is constant along the row axis,
    # so its tile is not re-DMA'd every step.
    o_ref[...] = (x_ref[...] * gamma_ref[...]).astype(o_ref.dtype)


@functools.lru_cache(maxsize=None)
def _hw_params():
    """Returns (combined in+out block byte budget, physical VMEM bytes or None, TCs/chip)."""
    target_block_bytes = 4 << 20   # conservative default if the chip cannot be queried
    vmem_cap = None
    num_cores = 1
    try:
        info = pltpu.get_tpu_info()
        cap = int(getattr(info, "vmem_capacity_bytes", 0) or 0)
        if cap > 0:
            vmem_cap = cap
        for name in ("num_cores", "num_tensorcores", "tensorcores_per_chip", "cores_per_chip"):
            v = getattr(info, name, None)
            if isinstance(v, int) and v > 0:
                num_cores = v
                break
    except Exception:
        pass  # off-TPU tracing / older jax: keep safe defaults
    if vmem_cap is not None:
        if vmem_cap <= (96 << 20):
            # v7x: 64 MiB VMEM per TC but fast HBM -> bigger blocks amortize per-step
            # overhead; it is also the only 2-TC generation.
            target_block_bytes = 12 << 20
            num_cores = max(num_cores, 2)
        else:
            # v5e / v6e: 128 MiB physical VMEM.
            target_block_bytes = 8 << 20
    return target_block_bytes, vmem_cap, num_cores


def _pick_tiles(rows, cols, bytes_per_elem, sub, target_block_bytes, num_cores):
    """(tile_rows, tile_cols): ~target_block_bytes combined in+out bytes per block, sublane/lane
    aligned, with >= 2 pipelined grid steps per TensorCore on multi-core chips."""
    # Column tiling only when even the minimum-sublane block overflows the budget (very wide D)
    # and the lane axis is a clean multiple of 128.
    tile_cols = cols
    if cols % 128 == 0 and cols > 128 and sub * cols * bytes_per_elem > target_block_bytes:
        tile_cols = max(128, (target_block_bytes // max(sub * bytes_per_elem, 1)) // 128 * 128)
        tile_cols = min(int(tile_cols), cols)
    row_bytes = tile_cols * bytes_per_elem

    if rows <= sub:
        return int(rows), int(tile_cols)   # block == full row extent: always a legal block shape

    t = max(sub, (target_block_bytes // max(row_bytes, 1)) // sub * sub)
    t = min(t, pl.cdiv(rows, sub) * sub)
    if num_cores > 1:
        # Give every TensorCore >= 2 steps so in-DMA / multiply / out-DMA overlap per core.
        min_steps = 2 * num_cores
        if pl.cdiv(rows, t) < min_steps:
            t = max(sub, pl.cdiv(pl.cdiv(rows, min_steps), sub) * sub)
    return int(t), int(tile_cols)


def _scale_2d(x2, g2, out_dtype):
    """x2: (rows, cols), g2: (1, cols) -> x2 * g2 as out_dtype via one pallas_call."""
    rows, cols = x2.shape
    x_item = jnp.dtype(x2.dtype).itemsize
    o_item = jnp.dtype(out_dtype).itemsize
    g_item = jnp.dtype(g2.dtype).itemsize
    bytes_per_elem = x_item + o_item            # budget the promoted output too (bf16 in / f32 out)
    sub = max(8, 32 // min(x_item, o_item))     # sublane multiple valid for both dtypes

    target_block_bytes, vmem_cap, num_cores = _hw_params()
    tile_rows, tile_cols = _pick_tiles(rows, cols, bytes_per_elem, sub,
                                       target_block_bytes, num_cores)
    grid = (pl.cdiv(rows, tile_rows), pl.cdiv(cols, tile_cols))

    # Explicit scoped-VMEM budget: in+out blocks double-buffered + gamma row + compiler scratch.
    needed = 2 * (tile_rows * tile_cols * bytes_per_elem + tile_cols * g_item) + (8 << 20)
    vmem_limit = None
    if vmem_cap is not None:
        vmem_limit = int(min(vmem_cap * 3 // 4, max(needed, 48 << 20)))

    semantics_candidates = []
    if num_cores > 1:
        # CORE_PARALLEL actually shards the row axis across v7x's 2 TensorCores.
        semantics_candidates.append((pltpu.CORE_PARALLEL, pltpu.PARALLEL))
    semantics_candidates.append(("parallel", "parallel"))

    last_err = None
    for sem in semantics_candidates:
        params = dict(dimension_semantics=sem)
        if vmem_limit is not None:
            params["vmem_limit_bytes"] = vmem_limit
        try:
            return pl.pallas_call(
                _layer_scale_kernel,
                out_shape=jax.ShapeDtypeStruct((rows, cols), out_dtype),
                grid_spec=pl.GridSpec(
                    grid=grid,
                    in_specs=[
                        pl.BlockSpec((tile_rows, tile_cols), lambda i, j: (i, j)),
                        pl.BlockSpec((1, tile_cols), lambda i, j: (0, j)),
                    ],
                    out_specs=pl.BlockSpec((tile_rows, tile_cols), lambda i, j: (i, j)),
                ),
                compiler_params=pltpu.CompilerParams(**params),
            )(x2, g2)
        except Exception as e:   # e.g. CORE_PARALLEL unsupported on this generation -> retry
            last_err = e
    raise last_err


def layer_scale(x, gamma):
    """LayerScale forward: x * gamma, gamma.shape == (x.shape[-1],)."""
    orig_shape = x.shape
    D = orig_shape[-1]
    assert gamma.shape == (D,), f"gamma shape {gamma.shape} != ({D},)"

    out_dtype = jnp.result_type(x.dtype, gamma.dtype)   # match PyTorch type promotion
    R = math.prod(orig_shape[:-1]) if len(orig_shape) > 1 else 1
    xf = x.reshape(R, D)

    if D % 128 == 0:
        # Already lane-dense.
        return _scale_2d(xf, gamma.reshape(1, D), out_dtype).reshape(orig_shape)

    # Lane-dense repack: view the flat data at lane width L = lcm(D, 128).  Column j of the
    # repacked view holds channel j % D, so tiling gamma `rep` times matches exactly.
    L = math.lcm(D, 128)
    rep = L // D
    R_bulk = (R // rep) * rep
    g_flat = gamma.reshape(1, D)

    if R_bulk == R and R_bulk > 0:
        g_tiled = jnp.tile(gamma, rep).reshape(1, L)
        return _scale_2d(xf.reshape(R // rep, L), g_tiled, out_dtype).reshape(orig_shape)

    if R_bulk >= 4 * rep:
        # Hybrid: keep the bulk on the lane-dense (full-width vst) path and run only the tiny
        # remainder lane-sparse.  Costs one slice + one concat copy but keeps >95% of the data
        # on the fast store path, a clear win for small D (lane utilization D/128).
        g_tiled = jnp.tile(gamma, rep).reshape(1, L)
        y_bulk = _scale_2d(xf[:R_bulk].reshape(R_bulk // rep, L), g_tiled, out_dtype)
        y_bulk = y_bulk.reshape(R_bulk, D)
        y_rem = _scale_2d(xf[R_bulk:], g_flat, out_dtype)
        return jnp.concatenate([y_bulk, y_rem], axis=0).reshape(orig_shape)

    # Small / oddly-shaped: lane-sparse but correct, single pass (block last dim == full D).
    return _scale_2d(xf, g_flat, out_dtype).reshape(orig_shape)


if __name__ == "__main__":
    key = jax.random.PRNGKey(0)

    batch, seq, projection_dim = 2, 8, 32
    init_values = 1e-4

    # Deterministic parameter init, mirroring torch.full((projection_dim,), init_values).
    gamma = jnp.full((projection_dim,), init_values, dtype=jnp.float32)
    x = jax.random.normal(key, (batch, seq, projection_dim), dtype=jnp.float32)

    y = layer_scale(x, gamma)
    jax.block_until_ready(y)

    # Reference check against plain JAX broadcasting (same semantics as PyTorch).
    y_ref = x * gamma
    assert y.shape == y_ref.shape and y.dtype == y_ref.dtype
    assert jnp.allclose(y, y_ref, atol=1e-6, rtol=1e-6), "mismatch vs reference"

    # Ragged / non-repackable shape: covers the lane-sparse fallback path.
    x_odd = jax.random.normal(jax.random.PRNGKey(1), (3, 5, projection_dim), jnp.float32)
    y_odd = layer_scale(x_odd, gamma)
    jax.block_until_ready(y_odd)
    assert jnp.allclose(y_odd, x_odd * gamma, atol=1e-6, rtol=1e-6), "mismatch (fallback)"

    # Larger ragged row count: covers the hybrid lane-dense bulk + lane-sparse remainder path.
    x_hyb = jax.random.normal(jax.random.PRNGKey(2), (67, projection_dim), jnp.float32)
    y_hyb = layer_scale(x_hyb, gamma)
    jax.block_until_ready(y_hyb)
    assert jnp.allclose(y_hyb, x_hyb * gamma, atol=1e-6, rtol=1e-6), "mismatch (hybrid)"

    # Mixed dtypes: bf16 activations with f32 gamma -> f32 output (promotion-aware budgeting).
    x_bf16 = jax.random.normal(jax.random.PRNGKey(3), (batch, seq, 128), jnp.bfloat16)
    g128 = jnp.full((128,), init_values, dtype=jnp.float32)
    y_bf16 = layer_scale(x_bf16, g128)
    jax.block_until_ready(y_bf16)
    y_bf16_ref = x_bf16 * g128
    assert y_bf16.dtype == y_bf16_ref.dtype
    assert jnp.allclose(y_bf16, y_bf16_ref, atol=1e-2, rtol=1e-2), "mismatch (bf16)"

    print("KERNEL_OK")
</pallas_src>

<mosaic_0001>
module attributes {stable_mosaic.version = 11 : i64} {
  func.func @_layer_scale_kernel(%arg0: i32, %arg1: i32, %arg2: memref<4x128xf32, #tpu.memory_space<vmem>>, %arg3: memref<1x128xf32, #tpu.memory_space<vmem>>, %arg4: memref<4x128xf32, #tpu.memory_space<vmem>>) attributes {dimension_semantics = [#tpu.dimension_semantics<parallel>, #tpu.dimension_semantics<parallel>], iteration_bounds = array<i64: 1, 1>, scalar_prefetch = 0 : i64, scratch_operands = 0 : i64, tpu.core_type = #tpu.core_type<tc>, window_params = [{transform_indices = @transform_0, window_bounds = array<i64: 4, 128>}, {transform_indices = @transform_1, window_bounds = array<i64: 1, 128>}, {transform_indices = @transform_2, window_bounds = array<i64: 4, 128>}]} {
    %c0 = arith.constant 0 : index
    %c0_0 = arith.constant 0 : index
    %0 = vector.load %arg2[%c0, %c0_0] : memref<4x128xf32, #tpu.memory_space<vmem>>, vector<4x128xf32>
    %c0_1 = arith.constant 0 : index
    %c0_2 = arith.constant 0 : index
    %1 = vector.load %arg3[%c0_1, %c0_2] : memref<1x128xf32, #tpu.memory_space<vmem>>, vector<1x128xf32>
    %2 = vector.broadcast %1 : vector<1x128xf32> to vector<4x128xf32>
    %3 = arith.mulf %0, %2 : vector<4x128xf32>
    %c0_3 = arith.constant 0 : index
    %c0_4 = arith.constant 0 : index
    %4 = vector.load %arg4[%c0_3, %c0_4] : memref<4x128xf32, #tpu.memory_space<vmem>>, vector<4x128xf32>
    tpu.vector_store %arg4[%c0_3, %c0_4], %3 {strides = array<i32>} : memref<4x128xf32, #tpu.memory_space<vmem>>, vector<4x128xf32>,
    return
  }
  func.func @transform_0(%arg0: i32, %arg1: i32) -> (i32, i32) {
    %c0_i32 = arith.constant 0 : i32
    return %arg0, %arg1 : i32, i32
  }
  func.func @transform_1(%arg0: i32, %arg1: i32) -> (i32, i32) {
    %c0_i32 = arith.constant 0 : i32
    %c0_i32_0 = arith.constant 0 : i32
    return %c0_i32, %arg1 : i32, i32
  }
  func.func @transform_2(%arg0: i32, %arg1: i32) -> (i32, i32) {
    %c0_i32 = arith.constant 0 : i32
    return %arg0, %arg1 : i32, i32
  }
}

</mosaic_0001>

<bundles_post_ra>
// kernel: tpu_custom_call.1
= control target key start
LH: loop header
LB: loop body
LE: loop exit
PB: predicated region body
PF: predicated region fallthrough
CT: control target
= control target key end

     0   :  { %7 = vsyncpa [#allocation3], 0  ;;  %s144_s0 = inlined_call_operand.hbm [shape: f32[4,128], index: 0, kind: input, shape index: {}]   ;;  %s145_s1 = inlined_call_operand.vmem [shape: f32[1,128], index: 1, kind: input, shape index: {}]   ;;  %s146_s2 = inlined_call_operand.hbm [shape: f32[4,128], index: 2, kind: output, shape index: {}]  }
   0x1   :  { %8 = vsyncpa [#allocation4], 0  ;;  %s100_s9 = smov [#allocation2]   ;;  %s52_s13 = scalar_lea.hbm %s144_s0, 64 }
   0x2   :  { %s15_s10 = sshll.u32 %s100_s9, 4  ;;  %p53_p0 = scmp.ne.s32.totalorder %s144_s0, %s52_s13  ;;  %s16_s10 = int_to_ptr.vmem [resolvable:$true] %s15_s10 }
   0x3   :  { %p56_p1 = scmp.lt.u32.totalorder %s52_s13, %s144_s0 }
   0x5   :  { %p58_p2 = pnand %p56_p1, %p53_p0 }
   0x7   :  { %61 = shalt.err (!%p58_p2)
}
   0x8   :  { %s62_s18 = scalar_lea.vmem %s16_s10, 64  ;;  %p67_p4 = scmp.lt.s32.totalorder %s16_s10, %s16_s10 }
   0x9   :  { %p63_p3 = scmp.ne.s32.totalorder %s16_s10, %s62_s18  ;;  %p68_p5 = scmp.lt.s32.totalorder %s62_s18, %s62_s18 }
   0xb   :  { %p69_p6 = por %p68_p5, %p67_p4 }
   0xd   :  { %p70_p7 = pnand %p69_p6, %p63_p3 }
   0xf   :  { %73 = shalt.err (!%p70_p7)
}
  0x10   :  { %18 = dma.hbm_to_vmem [thread:$0]  %s144_s0, 64, %s16_s10, [#allocation3]  }
  0x11   :  { %96 = dma.done.wait [#allocation3], 64  }
  0x12   :  { %97 = vsyncadd [#allocation3], 4294967232  ;;  %s101_s21 = smov [#allocation5]   ;;  %v24_v0 = vld [vmem:[#allocation2] sm:$0xf] }
  0x13   :  { %s40_s22 = sshll.u32 %s101_s21, 4  ;;  %v49_v1 = vld [vmem:[%s145_s1] ss:$0 sm:$0xff]  ;;  %s41_s22 = int_to_ptr.vmem [resolvable:$true] %s40_s22 }
  0x14   :  { %v32_v2 = vmul.f32 %v49_v1, %v24_v0  ;;  %s74_s25 = scalar_lea.vmem %s41_s22, 64  ;;  %p79_p9 = scmp.lt.s32.totalorder %s41_s22, %s41_s22 }
  0x15   :  { %p75_p8 = scmp.ne.s32.totalorder %s41_s22, %s74_s25  ;;  %p80_p10 = scmp.lt.s32.totalorder %s74_s25, %s74_s25 }
  0x16   :  { %33 = vst [vmem:[#allocation5] sm:$0xf] %v32_v2 }
  0x17   :  { %p81_p11 = por %p80_p10, %p79_p9 }
  0x19   :  { %p82_p12 = pnand %p81_p11, %p75_p8 }
  0x1b   :  { %85 = shalt.err (!%p82_p12)
}
  0x1c   :  { %s86_s27 = scalar_lea.hbm %s146_s2, 64 }
  0x1d   :  { %p87_p13 = scmp.ne.s32.totalorder %s146_s2, %s86_s27  ;;  %p90_p0 = scmp.lt.u32.totalorder %s86_s27, %s146_s2 }
  0x1f   :  { %p92_p1 = pnand %p90_p0, %p87_p13 }
  0x21   :  { %95 = shalt.err (!%p92_p1)
}
  0x22   :  { %43 = dma.vmem_to_hbm [thread:$0]  %s41_s22, 64, %s146_s2, [#allocation4]  }
  0x23   :  { %98 = dma.done.wait [#allocation4], 64  }
  0x24   :  { %99 = vsyncadd [#allocation4], 4294967232 }
  0x25   :  { %47 = vsyncpa [#allocation3], 1 }
  0x26   :  { %48 = vsyncpa [#allocation4], 1 }

</bundles_post_ra>
